<compile_context>
chip_gen: v7x
topology: tpu7x:2x2x1
jax: 0.10.0
libtpu: 0.0.40
codegen_flags: <defaults>
</compile_context>

<pallas_src>
import jax
import jax.numpy as jnp
from jax import lax
from jax.experimental import pallas as pl
from jax.experimental.pallas import tpu as pltpu


def _logreg_kernel(x_ref, w_ref, b_ref, o_ref):
    # x_ref: (TB, F) VMEM   w_ref: (1, F) VMEM   b_ref: (1,) SMEM   o_ref: (1, 1, TB) VMEM
    # Contract F of both operands -> (1, TB): lane-dense logits row on the MXU,
    # f32 accumulation regardless of input dtype.
    logits = lax.dot_general(
        w_ref[...], x_ref[...],
        dimension_numbers=(((1,), (1,)), ((), ())),
        preferred_element_type=jnp.float32,
    )                                            # (1, TB)
    out = jax.nn.sigmoid(logits + b_ref[0])      # scalar bias from SMEM
    o_ref[...] = out[None].astype(o_ref.dtype)   # (1, 1, TB) lane-dense store


def _choose_tile_b(batch, feat, itemsize):
    """Pick the batch tile TB and report VMEM capacity for vmem_limit sizing."""
    try:
        info = pltpu.get_tpu_info()
        vmem_cap = int(getattr(info, "vmem_capacity_bytes", 64 << 20))
    except Exception:  # pragma: no cover - fall back to the tightest budget (v7x)
        vmem_cap = 64 << 20

    # Double-buffered x slab budget: ~40 MiB on 64 MiB-VMEM chips (v7x),
    # ~48 MiB on 128 MiB-VMEM chips (v5e / v6e).
    slab_budget = (40 << 20) if vmem_cap <= (64 << 20) else (48 << 20)

    # Sublane packing: 8 rows for f32, 16 for bf16, 32 for int8/fp8.
    sublane = max(8, 32 // max(1, itemsize))

    def _round_up(v, m):
        return ((v + m - 1) // m) * m

    tb = slab_budget // (2 * feat * itemsize)            # double-buffered x block
    # Guarantee >= 2 grid steps when possible so a 2-TC chip shards the batch axis.
    tb = min(tb, _round_up(-(-batch // 2), sublane))
    # Never exceed the (sublane-rounded) batch itself.
    tb = min(tb, _round_up(batch, sublane))
    # Lane-dense alignment of the (1, TB) output row when big enough.
    if tb >= 128:
        tb = (tb // 128) * 128
    else:
        tb = max(sublane, (tb // sublane) * sublane)
    return int(tb), vmem_cap


def logistic_regression(x, w, b):
    """sigmoid(x @ w^T + b) with x:(B,F), w:(1,F) (or (F,1)/(F,)), b:(1,) -> (B,1) f32."""
    B, F = x.shape
    w = jnp.asarray(w).reshape(1, F).astype(x.dtype)      # weight follows x's dtype
    b = jnp.asarray(b, dtype=jnp.float32).reshape(1)

    itemsize = jnp.dtype(x.dtype).itemsize
    TB, vmem_cap = _choose_tile_b(B, F, itemsize)
    num_tiles = pl.cdiv(B, TB)

    # Resident VMEM: 2x x block (double-buffered) + 2x out block + weight row.
    needed = 2 * TB * F * itemsize + 2 * TB * 4 + F * itemsize
    vmem_limit = int(min(vmem_cap, max(needed + (8 << 20), 16 << 20)))

    cost = pl.CostEstimate(
        flops=2 * B * F,
        transcendentals=B,
        bytes_accessed=B * F * itemsize + F * itemsize + 4 + num_tiles * TB * 4,
    )

    out = pl.pallas_call(
        _logreg_kernel,
        out_shape=jax.ShapeDtypeStruct((num_tiles, 1, TB), jnp.float32),
        grid_spec=pl.GridSpec(
            grid=(num_tiles,),
            in_specs=[
                pl.BlockSpec((TB, F), lambda i: (i, 0)),              # x: streamed batch tiles
                pl.BlockSpec((1, F), lambda i: (0, 0)),               # w: resident row
                pl.BlockSpec(memory_space=pltpu.MemorySpace.SMEM),    # b: scalar in SMEM
            ],
            out_specs=pl.BlockSpec((1, 1, TB), lambda i: (i, 0, 0)),  # lane-dense logits row
        ),
        compiler_params=pltpu.CompilerParams(
            dimension_semantics=("parallel",),   # embarrassingly parallel batch axis
            vmem_limit_bytes=vmem_limit,
        ),
        cost_estimate=cost,
    )(x, w, b)

    # (num_tiles, 1, TB) -> flat row-major covers rows [0, num_tiles*TB); drop tail.
    return out.reshape(-1)[:B].reshape(B, 1)


if __name__ == "__main__":
    # Small shapes consistent with the module: img_feat_size=32, text_feat_size=32
    img_feat_size, text_feat_size = 32, 32
    feat = img_feat_size + text_feat_size
    batch = 8

    key = jax.random.PRNGKey(0)
    kx, kw, kb = jax.random.split(key, 3)

    x = jax.random.normal(kx, (batch, feat), dtype=jnp.float32)
    # nn.Linear(feat, 1) init: uniform(-1/sqrt(feat), 1/sqrt(feat))
    bound = 1.0 / jnp.sqrt(jnp.float32(feat))
    w = jax.random.uniform(kw, (1, feat), dtype=jnp.float32, minval=-bound, maxval=bound)
    b = jax.random.uniform(kb, (1,), dtype=jnp.float32, minval=-bound, maxval=bound)

    out = logistic_regression(x, w, b)
    out = jax.block_until_ready(out)

    # Reference check in plain JAX.
    ref = jax.nn.sigmoid(x @ w.T + b)
    assert out.shape == (batch, 1)
    assert jnp.allclose(out, ref, atol=1e-4, rtol=1e-4)

    print("KERNEL_OK")
</pallas_src>

<mosaic_0001>
module attributes {stable_mosaic.version = 11 : i64} {
  func.func @_logreg_kernel(%arg0: i32, %arg1: memref<8x64xf32, #tpu.memory_space<vmem>>, %arg2: memref<1x64xf32, #tpu.memory_space<vmem>>, %arg3: memref<1xf32, #tpu.memory_space<smem>>, %arg4: memref<1x1x8xf32, #tpu.memory_space<vmem>>) attributes {dimension_semantics = [#tpu.dimension_semantics<parallel>], iteration_bounds = array<i64: 1>, scalar_prefetch = 0 : i64, scratch_operands = 0 : i64, tpu.core_type = #tpu.core_type<tc>, window_params = [{transform_indices = @transform_0, window_bounds = array<i64: 8, 64>}, {pipeline_mode = #tpu.pipeline_mode<synchronous>, transform_indices = @transform_1, window_bounds = array<i64: 1, 64>}, {transform_indices = @transform_2, window_bounds = array<i64: 1>}, {transform_indices = @transform_3, window_bounds = array<i64: 1, 1, 8>}]} {
    %c0 = arith.constant 0 : index
    %c0_0 = arith.constant 0 : index
    %0 = vector.load %arg2[%c0, %c0_0] : memref<1x64xf32, #tpu.memory_space<vmem>>, vector<1x64xf32>
    %c0_1 = arith.constant 0 : index
    %c0_2 = arith.constant 0 : index
    %1 = vector.load %arg1[%c0_1, %c0_2] : memref<8x64xf32, #tpu.memory_space<vmem>>, vector<8x64xf32>
    %cst = arith.constant dense<0.000000e+00> : vector<1x8xf32>
    %2 = tpu.matmul %0, %1, %cst {dimension_numbers = #tpu.dot_dimension_numbers<[1], [1], [0], [0], [0, 0, 1, 0], [], []>} : vector<1x64xf32>, vector<8x64xf32>, vector<1x8xf32> -> vector<1x8xf32>
    %c0_3 = arith.constant 0 : index
    %3 = memref.load %arg3[%c0_3] : memref<1xf32, #tpu.memory_space<smem>>
    %4 = vector.broadcast %3 : f32 to vector<1x8xf32>
    %5 = arith.addf %2, %4 : vector<1x8xf32>
    %6 = arith.negf %5 : vector<1x8xf32>
    %7 = math.exp %6 : vector<1x8xf32>
    %cst_4 = arith.constant 1.000000e+00 : f32
    %8 = vector.broadcast %cst_4 : f32 to vector<1x8xf32>
    %9 = arith.addf %8, %7 : vector<1x8xf32>
    %10 = arith.divf %8, %9 : vector<1x8xf32>
    %11 = vector.shape_cast %10 : vector<1x8xf32> to vector<1x1x8xf32>
    %c0_5 = arith.constant 0 : index
    %c0_6 = arith.constant 0 : index
    %c0_7 = arith.constant 0 : index
    %12 = vector.load %arg4[%c0_5, %c0_6, %c0_7] : memref<1x1x8xf32, #tpu.memory_space<vmem>>, vector<1x1x8xf32>
    tpu.vector_store %arg4[%c0_5, %c0_6, %c0_7], %11 {strides = array<i32>} : memref<1x1x8xf32, #tpu.memory_space<vmem>>, vector<1x1x8xf32>,
    return
  }
  func.func @transform_0(%arg0: i32) -> (i32, i32) {
    %c0_i32 = arith.constant 0 : i32
    %c0_i32_0 = arith.constant 0 : i32
    return %arg0, %c0_i32 : i32, i32
  }
  func.func @transform_1(%arg0: i32) -> (i32, i32) {
    %c0_i32 = arith.constant 0 : i32
    %c0_i32_0 = arith.constant 0 : i32
    %c0_i32_1 = arith.constant 0 : i32
    return %c0_i32, %c0_i32_0 : i32, i32
  }
  func.func @transform_2(%arg0: i32) -> i32 {
    %c0_i32 = arith.constant 0 : i32
    %c0_i32_0 = arith.constant 0 : i32
    return %c0_i32 : i32
  }
  func.func @transform_3(%arg0: i32) -> (i32, i32, i32) {
    %c0_i32 = arith.constant 0 : i32
    %c0_i32_0 = arith.constant 0 : i32
    %c0_i32_1 = arith.constant 0 : i32
    return %arg0, %c0_i32, %c0_i32_0 : i32, i32, i32
  }
}

</mosaic_0001>

<bundles_post_ra>
// kernel: tpu_custom_call.1
= control target key start
LH: loop header
LB: loop body
LE: loop exit
PB: predicated region body
PF: predicated region fallthrough
CT: control target
= control target key end

     0   :  { %9 = vsyncpa [#allocation4], 0  ;;  %s252_s0 = inlined_call_operand.hbm [shape: f32[8,64], index: 0, kind: input, shape index: {}]   ;;  %s253_s1 = inlined_call_operand.vmem [shape: f32[1,64], index: 1, kind: input, shape index: {}]   ;;  %s254_s2 = inlined_call_operand.<no memory space> [shape: f32[1], index: 2, kind: input, shape index: {}]   ;;  %s255_s3 = inlined_call_operand.hbm [shape: f32[1,1,8], index: 3, kind: output, shape index: {}]  }
   0x1   :  { %10 = vsyncpa [#allocation5], 0  ;;  %s198_s12 = smov [#allocation3]   ;;  %s150_s16 = scalar_lea.hbm %s252_s0, 128 }
   0x2   :  { %s17_s13 = sshll.u32 %s198_s12, 4  ;;  %p151_p0 = scmp.ne.s32.totalorder %s252_s0, %s150_s16  ;;  %s18_s13 = int_to_ptr.vmem [resolvable:$true] %s17_s13 }
   0x3   :  { %p154_p1 = scmp.lt.u32.totalorder %s150_s16, %s252_s0 }
   0x5   :  { %p156_p2 = pnand %p154_p1, %p151_p0 }
   0x7   :  { %159 = shalt.err (!%p156_p2)
}
   0x8   :  { %s160_s21 = scalar_lea.vmem %s18_s13, 128  ;;  %p165_p4 = scmp.lt.s32.totalorder %s18_s13, %s18_s13 }
   0x9   :  { %p161_p3 = scmp.ne.s32.totalorder %s18_s13, %s160_s21  ;;  %p166_p5 = scmp.lt.s32.totalorder %s160_s21, %s160_s21 }
   0xb   :  { %p167_p6 = por %p166_p5, %p165_p4 }
   0xd   :  { %p168_p7 = pnand %p167_p6, %p161_p3 }
   0xf   :  { %171 = shalt.err (!%p168_p7)
}
  0x10   :  { %20 = dma.hbm_to_vmem [thread:$0]  %s252_s0, 128, %s18_s13, [#allocation4]  }
  0x11   :  { %194 = dma.done.wait [#allocation4], 128  }
  0x12   :  { %195 = vsyncadd [#allocation4], 4294967168  ;;  %v199_v0 = vmov 0.0   ;;  %vm200_vm0 = vmmov 0   ;;  %vm32_vm1 = vcmask 523264   ;;  %v29_v1 = vld [vmem:[#allocation3] sm:$0xff]  ;;  %v31_v3 = vstv %s254_s2 }
  0x13   :  { %137 = vmatprep.subr.mxu0 %v199_v0  ;;  %139 = vmatprep.mubr.msk.f32.mxu0 %vm200_vm0, %v199_v0  ;;  %v28_v2 = vld [vmem:[%s253_s1] sm:$0x1]  ;;  %s201_s0 = smov [#allocation6]   ;;  %vm115_vm2 = vcmask 57344  }
  0x14   :  { %138 = vmatpush3.xpose.msk.msra.mxu0 %vm32_vm1, %v29_v1  ;;  %s123_s28 = sshll.u32 %s201_s0, 4  ;;  %s124_s28 = int_to_ptr.vmem [resolvable:$true] %s123_s28 }
  0x15   :  { %s172_s1 = scalar_lea.vmem %s124_s28, 16  ;;  %s176_s29 = scalar_lea.vmem %s124_s28, 32 }
  0x16   :  { %p173_p8 = scmp.ne.s32.totalorder %s124_s28, %s172_s1  ;;  %p177_p9 = scmp.lt.s32.totalorder %s124_s28, %s124_s28 }
  0x17   :  { %140 = vmatmul.mubr.msk.f32.vlgmr.msra.gmra.mrb[0].mxu0 %vm32_vm1, %v28_v2  ;;  %p178_p10 = scmp.lt.s32.totalorder %s176_s29, %s172_s1 }
  0x19   :  { %p179_p11 = por %p178_p10, %p177_p9 }
  0x1b   :  { %p180_p12 = pnand %p179_p11, %p173_p8 }
  0xea   :  { %v105_v4 = vpop.f32.mrb[0].mxu0 }
  0xeb   :  { %v106_v5 = vadd.f32 %v105_v4, %v31_v3  ;;  %v141_v6 = vpop.f32.mrb[1].mxu0 }
  0xed   :  { %v134_v7 = vmul.f32 -1.442695, %v106_v5 }
  0xef   :  { %146 = vpow2.f32 %v134_v7 }
  0xf9   :  { %v147_v8 = vpop.eup %146 }
  0xfa   :  { %v112_v9 = vadd.f32 1.0, %v147_v8 }
  0xfc   :  { %148 = vrcp.f32 %v112_v9 }
 0x106   :  { %v149_v10 = vpop.eup %148 }
 0x107   :  { %116 = vst.msk [vmem:[#allocation6] sm:$0x1] %vm115_vm2, %v149_v10 }
 0x108   :  { %183 = shalt.err (!%p180_p12)
}
 0x109   :  { %s184_s4 = scalar_lea.hbm %s255_s3, 16 }
 0x10a   :  { %p185_p13 = scmp.ne.s32.totalorder %s255_s3, %s184_s4  ;;  %p188_p0 = scmp.lt.u32.totalorder %s184_s4, %s255_s3 }
 0x10c   :  { %p190_p1 = pnand %p188_p0, %p185_p13 }
 0x10e   :  { %193 = shalt.err (!%p190_p1)
}
 0x10f   :  { %126 = dma.vmem_to_hbm [thread:$0]  %s124_s28, 16, %s255_s3, [#allocation5]  }
 0x110   :  { %196 = dma.done.wait [#allocation5], 16  }
 0x111   :  { %197 = vsyncadd [#allocation5], 4294967280 }
 0x112   :  { %130 = vsyncpa [#allocation4], 1 }
 0x113   :  { %131 = vsyncpa [#allocation5], 1 }

</bundles_post_ra>
